<compile_context>
chip_gen: v7x
topology: tpu7x:2x2x1
jax: 0.10.0
libtpu: 0.0.40
codegen_flags: <defaults>
</compile_context>

<pallas_src>
import functools
import math

import jax
import jax.numpy as jnp
from jax import lax
from jax.experimental import pallas as pl
from jax.experimental.pallas import tpu as pltpu


def _depthwise_linear_kernel(x_ref, w_ref, o_ref, *, tp):
    # x_ref: (tp, bsz, in_feat); w_ref: (tp, in_feat, tn); o_ref: (tp, bsz, tn)
    # One clean 2-D MXU matmul per position; no batch-dim dot_general, so no
    # in-kernel relayout/transpose work competing with the weight DMAs.
    def body(p, carry):
        o_ref[p] = jnp.dot(
            x_ref[p], w_ref[p], preferred_element_type=jnp.float32
        ).astype(o_ref.dtype)
        return carry

    lax.fori_loop(0, tp, body, None, unroll=(tp <= 16))


def _vmem_capacity_bytes():
    try:
        info = pltpu.get_tpu_info()
        cap = getattr(info, "vmem_capacity_bytes", None)
        if cap:
            return int(cap)
    except Exception:
        pass
    return 64 * 1024 * 1024  # conservative default: v7x per-TensorCore VMEM


def _divisors(n):
    return [d for d in range(1, n + 1) if n % d == 0]


def _pick_tiles(num_pos, bsz, in_feat, out_feat, x_item, w_item, o_item, budget):
    """Pick (tp, tn) = (positions per step, out_features per step).

    Constraints:
      * tp divides num_pos, tn divides out_feat.
      * tn is a multiple of 128 (lane-dense stores) or the full out_feat.
      * Double-buffered x / weight / out tiles fit `budget` bytes.
    Preference: (a) >=2 total grid steps (keep both v7x TensorCores busy),
    (b) largest streamed weight tile (amortize ~0.35us/step overhead),
    (c) fewest grid steps.
    """
    tn_cands = [d for d in _divisors(out_feat) if d % 128 == 0] or [out_feat]
    tp_cands = _divisors(num_pos)

    def footprint(tp, tn):
        return 2 * (tp * bsz * in_feat * x_item
                    + tp * in_feat * tn * w_item
                    + tp * bsz * tn * o_item)

    best_key, best_tp, best_tn = None, None, None
    for tn in tn_cands:
        for tp in tp_cands:
            if footprint(tp, tn) > budget:
                continue
            steps = (num_pos // tp) * (out_feat // tn)
            key = (steps >= 2, tp * in_feat * tn * w_item, -steps)
            if best_key is None or key > best_key:
                best_key, best_tp, best_tn = key, tp, tn
    if best_key is None:
        # Nothing fits the conservative budget: fall back to the smallest legal
        # tiles and rely on the generous vmem_limit_bytes set by the caller.
        return 1, min(tn_cands)
    return best_tp, best_tn


def depthwise_linear(x, weight):
    """x: (bsz, num_positions, in_features); weight: (num_positions, in, out)."""
    bsz, num_pos, in_feat = x.shape
    assert weight.shape[0] == num_pos and weight.shape[1] == in_feat
    out_feat = weight.shape[2]

    x_item = jnp.dtype(x.dtype).itemsize
    w_item = jnp.dtype(weight.dtype).itemsize
    o_item = x_item  # output keeps x.dtype

    vmem_cap = _vmem_capacity_bytes()
    tile_budget = (vmem_cap * 2) // 5                       # ~40% of physical VMEM
    vmem_limit = min((vmem_cap * 17) // 20, 100 * 1024 * 1024)

    tp, tn = _pick_tiles(num_pos, bsz, in_feat, out_feat,
                         x_item, w_item, o_item, tile_budget)
    grid = (num_pos // tp, out_feat // tn)  # out_features axis innermost

    cost = pl.CostEstimate(
        flops=2 * bsz * num_pos * in_feat * out_feat,
        transcendentals=0,
        bytes_accessed=(w_item * num_pos * in_feat * out_feat
                        + x_item * bsz * num_pos * in_feat
                        + o_item * bsz * num_pos * out_feat),
    )

    # One cheap transpose of the small activation tensor so each position's
    # (bsz, in_feat) slab sits on the leading dim -> clean 2-D dots in-kernel.
    x_t = jnp.transpose(x, (1, 0, 2))  # (num_pos, bsz, in_feat)

    out_t = pl.pallas_call(
        functools.partial(_depthwise_linear_kernel, tp=tp),
        out_shape=jax.ShapeDtypeStruct((num_pos, bsz, out_feat), x.dtype),
        grid_spec=pltpu.PrefetchScalarGridSpec(
            num_scalar_prefetch=0,
            grid=grid,
            in_specs=[
                # x tile: TP positions, full batch, full in_features.  Its
                # index_map ignores n, so it is not re-DMA'd across the inner
                # out_features steps.
                pl.BlockSpec((tp, bsz, in_feat), lambda p, n: (p, 0, 0)),
                # weight tile: TP positions, full in_features, TN out_features.
                pl.BlockSpec((tp, in_feat, tn), lambda p, n: (p, 0, n)),
            ],
            out_specs=pl.BlockSpec((tp, bsz, tn), lambda p, n: (p, 0, n)),
        ),
        compiler_params=pltpu.CompilerParams(
            dimension_semantics=("parallel", "parallel"),
            vmem_limit_bytes=vmem_limit,
        ),
        cost_estimate=cost,
    )(x_t, weight)

    return jnp.transpose(out_t, (1, 0, 2))  # (bsz, num_pos, out_feat)


def init_depthwise_linear_weight(key, num_positions, in_features, out_features,
                                 dtype=jnp.float32):
    # Mirrors nn.init.kaiming_uniform_(weight, a=sqrt(5)) for a 3D tensor:
    # fan_in = size(1) * prod(size(2:)) = in_features * out_features
    a = math.sqrt(5)
    gain = math.sqrt(2.0 / (1.0 + a * a))
    fan_in = in_features * out_features
    bound = math.sqrt(3.0) * gain / math.sqrt(fan_in)
    return jax.random.uniform(
        key, (num_positions, in_features, out_features),
        minval=-bound, maxval=bound, dtype=dtype,
    )


if __name__ == "__main__":
    bsz, num_positions, in_features, out_features = 2, 8, 32, 32

    key = jax.random.PRNGKey(0)
    kx, kw = jax.random.split(key)
    x = jax.random.normal(kx, (bsz, num_positions, in_features), dtype=jnp.float32)
    weight = init_depthwise_linear_weight(
        kw, num_positions, in_features, out_features
    )

    # f32 path: must match the reference einsum tightly.
    out = jax.block_until_ready(depthwise_linear(x, weight))
    ref = jnp.einsum("ijm,jmk->ijk", x, weight)
    assert out.shape == (bsz, num_positions, out_features)
    assert jnp.allclose(out, ref, atol=1e-5, rtol=1e-5)

    # bf16-weight path (recommended for the small-bsz weight-streaming regime);
    # f32 accumulation inside the kernel, generous tolerance vs. f32 reference.
    out_bf16 = jax.block_until_ready(
        depthwise_linear(x, weight.astype(jnp.bfloat16)))
    assert out_bf16.shape == (bsz, num_positions, out_features)
    assert jnp.allclose(out_bf16, ref, atol=5e-2, rtol=5e-2)

    print("KERNEL_OK")
</pallas_src>

<mosaic_0001>
module attributes {stable_mosaic.version = 11 : i64} {
  func.func @_depthwise_linear_kernel(%arg0: i32, %arg1: i32, %arg2: memref<4x2x32xf32, #tpu.memory_space<vmem>>, %arg3: memref<4x32x32xf32, #tpu.memory_space<vmem>>, %arg4: memref<4x2x32xf32, #tpu.memory_space<vmem>>) attributes {dimension_semantics = [#tpu.dimension_semantics<parallel>, #tpu.dimension_semantics<parallel>], iteration_bounds = array<i64: 2, 1>, scalar_prefetch = 0 : i64, scratch_operands = 0 : i64, tpu.core_type = #tpu.core_type<tc>, window_params = [{transform_indices = @transform_0, window_bounds = array<i64: 4, 2, 32>}, {transform_indices = @transform_1, window_bounds = array<i64: 4, 32, 32>}, {transform_indices = @transform_2, window_bounds = array<i64: 4, 2, 32>}]} {
    %c0_i32 = arith.constant 0 : i32
    %0 = arith.index_cast %c0_i32 : i32 to index
    %c0 = arith.constant 0 : index
    %c0_0 = arith.constant 0 : index
    %1 = vector.load %arg2[%0, %c0, %c0_0] : memref<4x2x32xf32, #tpu.memory_space<vmem>>, vector<1x2x32xf32>
    %2 = vector.shape_cast %1 : vector<1x2x32xf32> to vector<2x32xf32>
    %3 = arith.index_cast %c0_i32 : i32 to index
    %c0_1 = arith.constant 0 : index
    %c0_2 = arith.constant 0 : index
    %4 = vector.load %arg3[%3, %c0_1, %c0_2] : memref<4x32x32xf32, #tpu.memory_space<vmem>>, vector<1x32x32xf32>
    %5 = vector.shape_cast %4 : vector<1x32x32xf32> to vector<32x32xf32>
    %cst = arith.constant dense<0.000000e+00> : vector<2x32xf32>
    %6 = tpu.matmul %2, %5, %cst {dimension_numbers = #tpu.dot_dimension_numbers<[1], [0], [0], [1], [0, 0, 1, 1], [], []>} : vector<2x32xf32>, vector<32x32xf32>, vector<2x32xf32> -> vector<2x32xf32>
    %7 = arith.index_cast %c0_i32 : i32 to index
    %c0_3 = arith.constant 0 : index
    %c0_4 = arith.constant 0 : index
    %8 = vector.load %arg4[%7, %c0_3, %c0_4] : memref<4x2x32xf32, #tpu.memory_space<vmem>>, vector<1x2x32xf32>
    %9 = vector.shape_cast %8 : vector<1x2x32xf32> to vector<2x32xf32>
    %10 = vector.shape_cast %6 : vector<2x32xf32> to vector<1x2x32xf32>
    tpu.vector_store %arg4[%7, %c0_3, %c0_4], %10 {strides = array<i32>} : memref<4x2x32xf32, #tpu.memory_space<vmem>>, vector<1x2x32xf32>,
    %c1_i32 = arith.constant 1 : i32
    %11 = arith.index_cast %c1_i32 : i32 to index
    %c0_5 = arith.constant 0 : index
    %c0_6 = arith.constant 0 : index
    %12 = vector.load %arg2[%11, %c0_5, %c0_6] : memref<4x2x32xf32, #tpu.memory_space<vmem>>, vector<1x2x32xf32>
    %13 = vector.shape_cast %12 : vector<1x2x32xf32> to vector<2x32xf32>
    %14 = arith.index_cast %c1_i32 : i32 to index
    %c0_7 = arith.constant 0 : index
    %c0_8 = arith.constant 0 : index
    %15 = vector.load %arg3[%14, %c0_7, %c0_8] : memref<4x32x32xf32, #tpu.memory_space<vmem>>, vector<1x32x32xf32>
    %16 = vector.shape_cast %15 : vector<1x32x32xf32> to vector<32x32xf32>
    %cst_9 = arith.constant dense<0.000000e+00> : vector<2x32xf32>
    %17 = tpu.matmul %13, %16, %cst_9 {dimension_numbers = #tpu.dot_dimension_numbers<[1], [0], [0], [1], [0, 0, 1, 1], [], []>} : vector<2x32xf32>, vector<32x32xf32>, vector<2x32xf32> -> vector<2x32xf32>
    %18 = arith.index_cast %c1_i32 : i32 to index
    %c0_10 = arith.constant 0 : index
    %c0_11 = arith.constant 0 : index
    %19 = vector.load %arg4[%18, %c0_10, %c0_11] : memref<4x2x32xf32, #tpu.memory_space<vmem>>, vector<1x2x32xf32>
    %20 = vector.shape_cast %19 : vector<1x2x32xf32> to vector<2x32xf32>
    %21 = vector.shape_cast %17 : vector<2x32xf32> to vector<1x2x32xf32>
    tpu.vector_store %arg4[%18, %c0_10, %c0_11], %21 {strides = array<i32>} : memref<4x2x32xf32, #tpu.memory_space<vmem>>, vector<1x2x32xf32>,
    %c2_i32 = arith.constant 2 : i32
    %22 = arith.index_cast %c2_i32 : i32 to index
    %c0_12 = arith.constant 0 : index
    %c0_13 = arith.constant 0 : index
    %23 = vector.load %arg2[%22, %c0_12, %c0_13] : memref<4x2x32xf32, #tpu.memory_space<vmem>>, vector<1x2x32xf32>
    %24 = vector.shape_cast %23 : vector<1x2x32xf32> to vector<2x32xf32>
    %25 = arith.index_cast %c2_i32 : i32 to index
    %c0_14 = arith.constant 0 : index
    %c0_15 = arith.constant 0 : index
    %26 = vector.load %arg3[%25, %c0_14, %c0_15] : memref<4x32x32xf32, #tpu.memory_space<vmem>>, vector<1x32x32xf32>
    %27 = vector.shape_cast %26 : vector<1x32x32xf32> to vector<32x32xf32>
    %cst_16 = arith.constant dense<0.000000e+00> : vector<2x32xf32>
    %28 = tpu.matmul %24, %27, %cst_16 {dimension_numbers = #tpu.dot_dimension_numbers<[1], [0], [0], [1], [0, 0, 1, 1], [], []>} : vector<2x32xf32>, vector<32x32xf32>, vector<2x32xf32> -> vector<2x32xf32>
    %29 = arith.index_cast %c2_i32 : i32 to index
    %c0_17 = arith.constant 0 : index
    %c0_18 = arith.constant 0 : index
    %30 = vector.load %arg4[%29, %c0_17, %c0_18] : memref<4x2x32xf32, #tpu.memory_space<vmem>>, vector<1x2x32xf32>
    %31 = vector.shape_cast %30 : vector<1x2x32xf32> to vector<2x32xf32>
    %32 = vector.shape_cast %28 : vector<2x32xf32> to vector<1x2x32xf32>
    tpu.vector_store %arg4[%29, %c0_17, %c0_18], %32 {strides = array<i32>} : memref<4x2x32xf32, #tpu.memory_space<vmem>>, vector<1x2x32xf32>,
    %c3_i32 = arith.constant 3 : i32
    %33 = arith.index_cast %c3_i32 : i32 to index
    %c0_19 = arith.constant 0 : index
    %c0_20 = arith.constant 0 : index
    %34 = vector.load %arg2[%33, %c0_19, %c0_20] : memref<4x2x32xf32, #tpu.memory_space<vmem>>, vector<1x2x32xf32>
    %35 = vector.shape_cast %34 : vector<1x2x32xf32> to vector<2x32xf32>
    %36 = arith.index_cast %c3_i32 : i32 to index
    %c0_21 = arith.constant 0 : index
    %c0_22 = arith.constant 0 : index
    %37 = vector.load %arg3[%36, %c0_21, %c0_22] : memref<4x32x32xf32, #tpu.memory_space<vmem>>, vector<1x32x32xf32>
    %38 = vector.shape_cast %37 : vector<1x32x32xf32> to vector<32x32xf32>
    %cst_23 = arith.constant dense<0.000000e+00> : vector<2x32xf32>
    %39 = tpu.matmul %35, %38, %cst_23 {dimension_numbers = #tpu.dot_dimension_numbers<[1], [0], [0], [1], [0, 0, 1, 1], [], []>} : vector<2x32xf32>, vector<32x32xf32>, vector<2x32xf32> -> vector<2x32xf32>
    %40 = arith.index_cast %c3_i32 : i32 to index
    %c0_24 = arith.constant 0 : index
    %c0_25 = arith.constant 0 : index
    %41 = vector.load %arg4[%40, %c0_24, %c0_25] : memref<4x2x32xf32, #tpu.memory_space<vmem>>, vector<1x2x32xf32>
    %42 = vector.shape_cast %41 : vector<1x2x32xf32> to vector<2x32xf32>
    %43 = vector.shape_cast %39 : vector<2x32xf32> to vector<1x2x32xf32>
    tpu.vector_store %arg4[%40, %c0_24, %c0_25], %43 {strides = array<i32>} : memref<4x2x32xf32, #tpu.memory_space<vmem>>, vector<1x2x32xf32>,
    %c4_i32 = arith.constant 4 : i32
    return
  }
  func.func @transform_0(%arg0: i32, %arg1: i32) -> (i32, i32, i32) {
    %c0_i32 = arith.constant 0 : i32
    %c0_i32_0 = arith.constant 0 : i32
    %c0_i32_1 = arith.constant 0 : i32
    return %arg0, %c0_i32, %c0_i32_0 : i32, i32, i32
  }
  func.func @transform_1(%arg0: i32, %arg1: i32) -> (i32, i32, i32) {
    %c0_i32 = arith.constant 0 : i32
    %c0_i32_0 = arith.constant 0 : i32
    return %arg0, %c0_i32, %arg1 : i32, i32, i32
  }
  func.func @transform_2(%arg0: i32, %arg1: i32) -> (i32, i32, i32) {
    %c0_i32 = arith.constant 0 : i32
    %c0_i32_0 = arith.constant 0 : i32
    return %arg0, %c0_i32, %arg1 : i32, i32, i32
  }
}

</mosaic_0001>

<bundles_post_ra>
// kernel: tpu_custom_call.1
= control target key start
LH: loop header
LB: loop body
LE: loop exit
PB: predicated region body
PF: predicated region fallthrough
CT: control target
= control target key end

     0   :  { %7 = vsyncpa [#allocation3], 0  ;;  %s1323_s0 = inlined_call_operand.hbm [shape: f32[8,2,32], index: 0, kind: input, shape index: {}]   ;;  %s1324_s1 = inlined_call_operand.hbm [shape: f32[8,32,32], index: 1, kind: input, shape index: {}]   ;;  %s1325_s2 = inlined_call_operand.hbm [shape: f32[8,2,32], index: 2, kind: output, shape index: {}]  }
   0x1   :  { %9 = vsyncpa [#allocation3 + $0x1], 0 }
   0x2   :  { %10 = vsyncpa [#allocation6], 0 }
   0x3   :  { %12 = vsyncpa [#allocation6 + $0x1], 0 }
   0x4   :  { %13 = vsyncpa [#allocation4], 0 }
   0x5   :  { %15 = vsyncpa [#allocation4 + $0x1], 0  ;;  %s1058_s9 = smov 0   ;;  %s1060_s10 = smov 0  }
   0x6   :  { %s1062_s11 = smov 0   ;;  %s1064_s12 = smov 0  }
   0x7   :  { %s1066_s13 = smov 0   ;;  %s1068_s14 = smov 0  }
   0x8 LB: > { %s673_s15 = sadd.s32 4294967295, %s1029_s14   ;;  %s674_s16 = sadd.s32 4294967294, %s1029_s14   ;;  %s1029_s14 = sphi %s1068_s14, %s21_s14   ;;  %s1025_s13 = sphi %s1066_s13, %s1343_s13   ;;  %s1021_s12 = sphi %s1064_s12, %s1342_s12   ;;  %s1017_s11 = sphi %s1062_s11, %s1341_s11   ;;  %s1013_s10 = sphi %s1060_s10, %s1340_s10   ;;  %s1009_s9 = sphi %s1058_s9, %s1339_s9  }
   0x9   : > { %s33_s17 = sadd.s32 1, %s1025_s13  ;;  %s40_s18 = sadd.s32 1, %s1017_s11 }
   0xa   : > { %p35_p0 = scmp.ge.s32.totalorder %s33_s17, 2  ;;  %p47_p1 = scmp.ne.s32.totalorder %s1017_s11, %s1013_s10 }
   0xb   : > { %p48_p2 = scmp.eq.s32.totalorder %s1029_s14, 0  ;;  %p53_p3 = scmp.ne.s32.totalorder %s1013_s10, %s1009_s9 }
   0xc   : > { %s1345_s17 = smov (%p35_p0, %s33_s17), 0  ;;  %p54_p5 = scmp.eq.s32.totalorder %s673_s15, 0 }
   0xd   : > { %p1099_p4 = por %p48_p2, %p47_p1  ;;  %s37_s20 = ssub.s32 %s1025_s13, %s1345_s17 }
   0xe   : > { %p107_p6 = scmp.eq.s32.totalorder %s673_s15, 1  ;;  %p38_p7 = scmp.eq.s32.totalorder %s37_s20, 0 }
   0xf   : > { %p1105_p8 = por %p54_p5, %p53_p3  ;;  %p113_p10 = scmp.eq.s32.totalorder %s674_s16, 1 }
  0x10   : > { %p1109_p9 = por %p107_p6, %p47_p1  ;;  %p824_p13 = scmp.lt.s32.totalorder %s1029_s14, 2 }
  0x11   : > { %s1329_s21 = scalar_select %p1105_p8, 1, 0 }
  0x12   : > { %s1330_s22 = scalar_select %p1109_p9, 1, 0 }
  0x13   : > { %s1114_s23 = scalar_select %p38_p7, %s1017_s11, %s40_s18  }
  0x14   : > { %p1116_p11 = por %p113_p10, %p53_p3  ;;  %s1123_s25 = sand.u32 1, %s1017_s11  }
  0x15   : > { %s677_s26 = sshll.u32 %s1123_s25, 3  ;;  %s715_s27 = sshll.u32 %s1025_s13, 7 }
  0x16   : > { %s1331_s24 = scalar_select %p1116_p11, 1, 0 }
  0x17   : > { %s1130_s30 = scalar_lea.hbm %s1323_s0, %s715_s27  ;;  %s137_s3 = scalar_lea.vmem [#allocation2], %s677_s26 }
  0x18   : > { %s144_s4 = sshll.u32 %s137_s3, 4  ;;  %p1136_p0 = pnand %p824_p13, %p1099_p4  ;;  %s1132_s4 = int_to_ptr.vmem [resolvable:$true] %s144_s4 }
  0x19   : > { %s134_s6 = scalar_lea.sflag [#allocation3], %s1123_s25  ;;  %s883_s7 = scalar_lea.hbm %s1130_s30, 128 }
  0x1a   : > { %p884_p2 = scmp.ne.s32.totalorder %s1130_s30, %s883_s7  ;;  %p885_p3 = pneg %p1136_p0 }
  0x1b   : > { %s888_s16 = scalar_lea.hbm %s1323_s0, 256  ;;  %p889_p4 = scmp.lt.u32.totalorder %s1130_s30, %s1323_s0 }
  0x1c   : > { %p886_p5 = pnand %p885_p3, %p884_p2  ;;  %p890_p7 = scmp.lt.u32.totalorder %s888_s16, %s883_s7 }
  0x1d   : > { %p892_p13 = scmp.lt.u32.totalorder %s883_s7, %s1130_s30 }
  0x1e   : > { %p887_p6 = pneg %p886_p5  ;;  %p891_p10 = por %p890_p7, %p889_p4 }
  0x20   : > { %p893_p12 = por %p892_p13, %p891_p10 }
  0x22   : > { %p894_p1 = pnand %p893_p12, %p887_p6 }
  0x24   : > { %897 = shalt.err (!%p894_p1)
}
  0x25   : > { %s898_s20 = scalar_lea.vmem %s1132_s4, 128  ;;  %s1031_s26 = smov [#allocation2]  }
  0x26   : > { %p899_p2 = scmp.ne.s32.totalorder %s1132_s4, %s898_s20  ;;  %s903_s27 = sshll.u32 %s1031_s26, 4  ;;  %s904_s27 = int_to_ptr.vmem [resolvable:$false] %s903_s27 }
  0x27   : > { %s905_s28 = scalar_lea.vmem %s904_s27, 256  ;;  %p906_p9 = scmp.lt.s32.totalorder %s1132_s4, %s904_s27 }
  0x28   : > { %p901_p5 = pnand %p899_p2, %p885_p3  ;;  %p907_p4 = scmp.lt.s32.totalorder %s905_s28, %s898_s20 }
  0x2a   : > { %p902_p11 = pneg %p901_p5  ;;  %p908_p7 = por %p907_p4, %p906_p9 }
  0x2c   : > { %p909_p10 = pnand %p908_p7, %p902_p11 }
  0x2e   : > { %912 = shalt.err (!%p909_p10)
}
  0x2f   : > { %s1032_s29 = smov 32   ;;  %s1033_s3 = smov 2  }
  0x30   : > { %816 = dma.hbm_to_vmem [thread:$0]  (!%p1136_p0), %s1130_s30, 128, %s1132_s4, %s134_s6, %s1032_s29, %s1032_s29, %s1033_s3  }
  0x31   : > { %p175_p12 = scmp.lt.s32.totalorder %s1029_s14, 3  ;;  %s680_s7 = sshll.u32 %s1123_s25, 7 }
  0x32   : > { %s717_s8 = sshll.u32 %s1025_s13, 11  ;;  %p1333_p9 = scmp.ge.s32.totalorder %s1029_s14, 1 }
  0x33   : > { %s1181_s19 = scalar_lea.hbm %s1324_s1, %s717_s8  ;;  %s158_s20 = scalar_lea.vmem [#allocation5], %s680_s7 }
  0x34   : > { %p1174_p11 = pnand %p1333_p9, %p175_p12  ;;  %s167_s26 = sshll.u32 %s158_s20, 4  ;;  %s1183_s26 = int_to_ptr.vmem [resolvable:$true] %s167_s26 }
  0x35   : > { %s155_s30 = scalar_lea.sflag [#allocation6], %s1123_s25  ;;  %s913_s4 = scalar_lea.hbm %s1181_s19, 2048 }
  0x36   : > { %p914_p1 = scmp.ne.s32.totalorder %s1181_s19, %s913_s4  ;;  %s918_s28 = scalar_lea.hbm %s1324_s1, 4096 }
  0x37   : > { %p919_p2 = scmp.lt.u32.totalorder %s1181_s19, %s1324_s1  ;;  %p920_p5 = scmp.lt.u32.totalorder %s918_s28, %s913_s4 }
  0x38   : > { %p916_p6 = pnand %p914_p1, %p885_p3  ;;  %p922_p7 = scmp.lt.u32.totalorder %s913_s4, %s1181_s19 }
  0x39   : > { %p921_p4 = por %p920_p5, %p919_p2 }
  0x3a   : > { %p917_p13 = pneg %p916_p6 }
  0x3b   : > { %p923_p10 = por %p922_p7, %p921_p4 }
  0x3d   : > { %p924_p12 = pnand %p923_p10, %p917_p13 }
  0x3f   : > { %927 = shalt.err (!%p924_p12)
}
  0x40   : > { %s928_s7 = scalar_lea.vmem %s1183_s26, 2048  ;;  %s1034_s8 = smov [#allocation5]  }
  0x41   : > { %p929_p9 = scmp.ne.s32.totalorder %s1183_s26, %s928_s7  ;;  %s933_s16 = sshll.u32 %s1034_s8, 4  ;;  %s934_s16 = int_to_ptr.vmem [resolvable:$false] %s933_s16 }
  0x42   : > { %s935_s18 = scalar_lea.vmem %s934_s16, 4096  ;;  %p936_p8 = scmp.lt.s32.totalorder %s1183_s26, %s934_s16 }
  0x43   : > { %p931_p1 = pnand %p929_p9, %p885_p3  ;;  %p937_p2 = scmp.lt.s32.totalorder %s935_s18, %s928_s7 }
  0x45   : > { %p932_p6 = pneg %p931_p1  ;;  %p938_p5 = por %p937_p2, %p936_p8 }
  0x47   : > { %p939_p4 = pnand %p938_p5, %p932_p6 }
  0x49   : > { %942 = shalt.err (!%p939_p4)
}
  0x4a   : > { %s1035_s20 = smov 128   ;;  %s1036_s4 = smov 8  }
  0x4b   : > { %819 = dma.hbm_to_vmem [thread:$0]  (!%p1136_p0), %s1181_s19, 2048, %s1183_s26, %s155_s30, %s1035_s20, %s1035_s20, %s1036_s4  }
  0x4c   : > { %179 = sbr.rel (%p1174_p11) target bundleno = 333 (0x14d), region = 28  ;;  %s1214_s6 = sand.u32 (!%p1174_p11), 1, %s1013_s10  }
  0x4d   : > { %s685_s27 = sshll.u32 (!%p1174_p11), %s1214_s6, 3  ;;  %s182_s28 = scalar_lea.sflag (!%p1174_p11), [#allocation3], %s1214_s6 }
  0x4e   : > { %s1220_s29 = scalar_lea.vmem (!%p1174_p11), [#allocation2], %s685_s27  ;;  %p1335_p8 = scmp.ne.s32.totalorder (!%p1174_p11), %s1329_s21, 0 }
  0x53   : > { %996 = dma.done.wait (%p1335_p8), %s182_s28, 128  }
  0x54   : > { %998 = vsyncadd (%p1335_p8), %s182_s28, 4294967168  ;;  %s686_s25 = sshll.u32 %s1214_s6, 7  ;;  %s191_s5 = scalar_lea.sflag [#allocation6], %s1214_s6 }
  0x55   : > { %s1228_s15 = scalar_lea.vmem [#allocation5], %s686_s25 }
  0x56   : > { %1000 = dma.done.wait (%p1335_p8), %s191_s5, 2048  }
  0x57   : > { %1002 = vsyncadd (%p1335_p8), %s191_s5, 4294965248  ;;  %v1037_v0 = vmov 0.0|0.0   ;;  %vm1038_vm0 = vmmov 0   ;;  %v1039_v1 = vmov 0.0   ;;  %v224_v2 = vld [vmem:[%s1228_s15] sm:$0xff]  ;;  %v225_v3 = vld [vmem:[%s1228_s15 + $0x8] sm:$0xff] }
  0x58   : > { %783 = vmatprep.subr.bf16.mxu0 %v1037_v0  ;;  %789 = vmatprep.subr.bf16.mxu1 %v1037_v0  ;;  %v690_v4 = vld [vmem:[%s1228_s15 + $0x20] sm:$0xff]  ;;  %v784_v5 = vpack.c.bf16 %v225_v3, %v224_v2  ;;  %v691_v6 = vld [vmem:[%s1228_s15 + $0x28] sm:$0xff]  ;;  %v226_v7 = vld [vmem:[%s1228_s15 + $0x10] sm:$0xff]  ;;  %vm228_vm1 = vcmask 261120   ;;  %vm302_vm2 = vcmask 254976   ;;  %s219_s21 = scalar_lea.vmem [#allocation7], %s685_s27 }
  0x59   : > { %747 = vmatprep.mubr.msk.f32.mxu0 %vm1038_vm0, %v1039_v1  ;;  %758 = vmatprep.mubr.msk.f32.mxu1 %vm1038_vm0, %v1039_v1  ;;  %v227_v8 = vld [vmem:[%s1228_s15 + $0x18] sm:$0xff]  ;;  %v790_v9 = vpack.c.bf16 %v691_v6, %v690_v4  ;;  %v692_v10 = vld [vmem:[%s1228_s15 + $0x30] sm:$0xff]  ;;  %v697_v14 = vld [vmem:[%s1228_s15 + $0x40] sm:$0xff]  ;;  %s565_s19 = sshll.u32 %s219_s21, 4  ;;  %s718_s26 = sshll.u32 %s1021_s12, 7  ;;  %s1267_s19 = int_to_ptr.vmem [resolvable:$true] %s565_s19 }
  0x5a   : > { %v693_v11 = vld [vmem:[%s1228_s15 + $0x38] sm:$0xff]  ;;  %785 = vmatpush3.bf16.msra.mxu0 %v784_v5  ;;  %v787_v12 = vpack.c.bf16 %v227_v8, %v226_v7  ;;  %v698_v15 = vld [vmem:[%s1228_s15 + $0x48] sm:$0xff]  ;;  %v704_v16 = vld [vmem:[%s1228_s15 + $0x60] sm:$0xff]  ;;  %s1272_s7 = scalar_lea.hbm %s1325_s2, %s718_s26  ;;  %s551_s8 = scalar_lea.sflag [#allocation4], %s1214_s6 }
  0x5b   : > { %791 = vmatpush3.bf16.msra.mxu1 %v790_v9  ;;  %786 = vmatprep.subr.bf16.mxu0 %v1037_v0  ;;  %v793_v13 = vpack.c.bf16 %v693_v11, %v692_v10  ;;  %v705_v17 = vld [vmem:[%s1228_s15 + $0x68] sm:$0xff]  ;;  %v223_v18 = vld [vmem:[%s1220_s29] sm:$0x3]  ;;  %v796_v19 = vpack.c.bf16 %v698_v15, %v697_v14  ;;  %v689_v20 = vld [vmem:[%s1220_s29 + $0x2] sm:$0x3]  ;;  %s943_s12 = scalar_lea.vmem %s1267_s19, 128 }
  0x5c   : > { %792 = vmatprep.subr.bf16.mxu1 %v1037_v0  ;;  %v802_v21 = vpack.c.bf16 %v705_v17, %v704_v16  ;;  %v699_v22 = vld [vmem:[%s1228_s15 + $0x50] sm:$0xff]  ;;  %v700_v23 = vld [vmem:[%s1228_s15 + $0x58] sm:$0xff]  ;;  %p944_p0 = scmp.ne.s32.totalorder %s1267_s19, %s943_s12  ;;  %p1336_p3 = scmp.ne.s32.totalorder %s1330_s22, 0 }
  0x5d   : > { %v706_v24 = vld [vmem:[%s1228_s15 + $0x70] sm:$0xff]  ;;  %v707_v25 = vld [vmem:[%s1228_s15 + $0x78] sm:$0xff]  ;;  %v799_v26 = vpack.c.bf16 %v700_v23, %v699_v22  ;;  %s1040_s16 = smov [#allocation7]  }
  0x5e   : > { %788 = vmatpush3.bf16.msra.mxu0 %v787_v12  ;;  %v805_v27 = vpack.c.bf16 %v707_v25, %v706_v24  ;;  %v696_v28 = vld [vmem:[%s1220_s29 + $0x4] sm:$0x3]  ;;  %v703_v29 = vld [vmem:[%s1220_s29 + $0x6] sm:$0x3]  ;;  %p945_p11 = pnand %p944_p0, %p1336_p3  ;;  %s947_s18 = sshll.u32 %s1040_s16, 4  ;;  %s948_s18 = int_to_ptr.vmem [resolvable:$false] %s947_s18 }
  0x5f   : > { %794 = vmatpush3.bf16.msra.mxu1 %v793_v13  ;;  %795 = vmatprep.subr.bf16.mxu0 %v1037_v0  ;;  %s949_s20 = scalar_lea.vmem %s948_s18, 256  ;;  %p950_p7 = scmp.lt.s32.totalorder %s1267_s19, %s948_s18 }
  0x60   : > { %801 = vmatprep.subr.bf16.mxu1 %v1037_v0  ;;  %p946_p13 = pneg %p945_p11  ;;  %p951_p10 = scmp.lt.s32.totalorder %s949_s20, %s943_s12 }
  0x61   : > { %748 = vmatmul.mubr.msk.f32.vlgmr.msra.gmra.mrb[0].mxu0 %vm228_vm1, %v223_v18 }
  0x62   : > { %759 = vmatmul.mubr.msk.f32.vlgmr.msra.gmra.mrb[0].mxu1 %vm228_vm1, %v689_v20  ;;  %797 = vmatpush3.bf16.msra.mxu0 %v796_v19  ;;  %p952_p12 = por %p951_p10, %p950_p7 }
  0x63   : > { %803 = vmatpush3.bf16.msra.mxu1 %v802_v21  ;;  %798 = vmatprep.subr.bf16.mxu0 %v1037_v0 }
  0x64   : > { %804 = vmatprep.subr.bf16.mxu1 %v1037_v0  ;;  %769 = vmatprep.mubr.msk.f32.mxu0 %vm1038_vm0, %v1039_v1  ;;  %p953_p9 = pnand %p952_p12, %p946_p13 }
  0x65   : > { %780 = vmatprep.mubr.msk.f32.mxu1 %vm1038_vm0, %v1039_v1 }
  0x66   : > { %800 = vmatpush3.bf16.msra.mxu0 %v799_v26 }
  0x67   : > { %806 = vmatpush3.bf16.msra.mxu1 %v805_v27 }
  0x69   : > { %770 = vmatmul.mubr.msk.f32.vlgmr.msra.gmra.mrb[2].mxu0 %vm228_vm1, %v696_v28 }
  0x6a   : > { %781 = vmatmul.mubr.msk.f32.vlgmr.msra.gmra.mrb[2].mxu1 %vm228_vm1, %v703_v29 }
 0x134   : > { %v298_v30 = vpop.f32.mrb[0].mxu0 }
 0x135   : > { %303 = vst.msk [vmem:[%s219_s21] sm:$0x3] %vm302_vm2, %v298_v30  ;;  %v380_v31 = vpop.f32.mrb[0].mxu1  ;;  %v749_v32 = vpop.f32.mrb[1].mxu0 }
 0x136   : > { %695 = vst.msk [vmem:[%s219_s21 + $0x2] sm:$0x3] %vm302_vm2, %v380_v31  ;;  %v760_v33 = vpop.f32.mrb[1].mxu1 }
 0x13c   : > { %v462_v34 = vpop.f32.mrb[2].mxu0 }
 0x13d   : > { %702 = vst.msk [vmem:[%s219_s21 + $0x4] sm:$0x3] %vm302_vm2, %v462_v34  ;;  %v544_v35 = vpop.f32.mrb[2].mxu1  ;;  %v771_v36 = vpop.f32.mrb[3].mxu0 }
 0x13e   : > { %709 = vst.msk [vmem:[%s219_s21 + $0x6] sm:$0x3] %vm302_vm2, %v544_v35  ;;  %v782_v37 = vpop.f32.mrb[3].mxu1 }
 0x13f   : > { %956 = shalt.err (!%p953_p9)
}
 0x140   : > { %s957_s4 = scalar_lea.hbm %s1272_s7, 128  ;;  %s961_s29 = scalar_lea.hbm %s1325_s2, 256 }
 0x141   : > { %p958_p1 = scmp.ne.s32.totalorder %s1272_s7, %s957_s4  ;;  %p962_p5 = scmp.lt.u32.totalorder %s1272_s7, %s1325_s2 }
 0x142   : > { %p963_p4 = scmp.lt.u32.totalorder %s961_s29, %s957_s4  ;;  %p965_p0 = scmp.lt.u32.totalorder %s957_s4, %s1272_s7 }
 0x143   : > { %p959_p6 = pnand %p958_p1, %p1336_p3 }
 0x144   : > { %p964_p8 = por %p963_p4, %p962_p5 }
 0x145   : > { %p960_p2 = pneg %p959_p6 }
 0x146   : > { %p966_p11 = por %p965_p0, %p964_p8 }
 0x148   : > { %p967_p13 = pnand %p966_p11, %p960_p2 }
 0x14a   : > { %970 = shalt.err (!%p967_p13)
}
 0x14b   : > { %s1041_s15 = smov 32   ;;  %s1042_s21 = smov 2  }
 0x14c   : > { %811 = dma.vmem_to_hbm [thread:$0]  (%p1336_p3), %s1267_s19, 128, %s1272_s7, %s551_s8, %s1041_s15, %s1041_s15, %s1042_s21  }
 0x14d PF: > { %s580_s26 = sand.u32 1, %s1009_s9   ;;  %p1337_p7 = scmp.ne.s32.totalorder %s1331_s24, 0 }
 0x14e   : > { %p1338_p10 = scmp.ge.s32.totalorder %s1029_s14, 2  ;;  %s581_s30 = scalar_lea.sflag [#allocation4], %s580_s26 }
 0x150   : > { %p821_p12 = pnand %p1338_p10, %p1337_p7 }
 0x152   : > { %1004 = dma.done.wait (!%p821_p12), %s581_s30, 128  }
 0x153   : > { %1006 = vsyncadd (!%p821_p12), %s581_s30, 4294967168  ;;  %s21_s14 = sadd.s32 1, %s1029_s14   ;;  %s1339_s9 = smov %s1013_s10 }
 0x154   : > { %p18_p9 = scmp.ge.s32.totalorder %s21_s14, 4   ;;  %s1340_s10 = smov %s1017_s11 }
 0x155   : > { %s1341_s11 = smov %s1114_s23  ;;  %s1342_s12 = smov %s1025_s13 }
 0x156   : > { %s1343_s13 = smov %s1345_s17  ;;  %20 = sbr.rel (!%p18_p9) target bundleno = 8 (0x8), region = 95 }
 0x15d   :  { %586 = vsyncpa [#allocation3], 1 }
 0x15e   :  { %588 = vsyncpa [#allocation3 + $0x1], 1 }
 0x15f   :  { %589 = vsyncpa [#allocation6], 1 }
 0x160   :  { %591 = vsyncpa [#allocation6 + $0x1], 1 }
 0x161   :  { %592 = vsyncpa [#allocation4], 1 }
 0x162   :  { %594 = vsyncpa [#allocation4 + $0x1], 1 }

</bundles_post_ra>
